<compile_context>
chip_gen: v7x
topology: tpu7x:2x2x1
jax: 0.10.0
libtpu: 0.0.40
codegen_flags: <defaults>
</compile_context>

<pallas_src>
import math

import jax
import jax.numpy as jnp
from jax.experimental import pallas as pl
from jax.experimental.pallas import tpu as pltpu


def _round_up(x: int, m: int) -> int:
    return ((x + m - 1) // m) * m


def _value_mlp_kernel(x_ref, w1_ref, b1_ref, w2_ref, b2_ref, w3_ref, b3_ref,
                      o_ref):
    """Fused 3-layer value-MLP forward for one batch tile.

    x_ref  : (bt, S)  bf16   state tile (pipelined over the grid)
    w1_ref : (S, H)   bf16
    b1_ref : (1, H)   f32
    w2_ref : (H, H)   bf16
    b2_ref : (1, H)   f32
    w3_ref : (1, H)   f32    final-layer weight as a row
    b3_ref : (1,)     f32    SMEM scalar
    o_ref  : (1, bt)  f32    lane-dense output row (batch on the lane axis)
    """
    # Layer 1: bf16 MXU matmul, f32 accumulation.  NOTE: K = state_dim is tiny,
    # so this pass underutilizes the MXU's K dimension; it is a negligible
    # fraction of the FLOPs (layer 2 is the real MXU consumer).
    h1 = jnp.dot(x_ref[...], w1_ref[...], preferred_element_type=jnp.float32)
    h1 = jnp.maximum(h1 + b1_ref[...], 0.0)

    # Layer 2: bf16 MXU matmul, f32 accumulation.
    h2 = jnp.dot(h1.astype(jnp.bfloat16), w2_ref[...],
                 preferred_element_type=jnp.float32)
    h2 = jnp.maximum(h2 + b2_ref[...], 0.0)

    # Layer 3 (out_features == 1): an N=1 MXU matmul would burn a full result
    # pass for one useful column, so do it on the VPU (multiply) + XLU (lane
    # reduction) instead.  Result lands lane-dense as a (1, bt) row.
    v = jnp.sum(h2 * w3_ref[...], axis=-1)           # (bt,) f32
    o_ref[...] = (v + b3_ref[0])[None, :]            # (1, bt) unmasked store


def value_network_forward(state, params, *, batch_tile=None):
    """Run the ValueNetwork forward pass via the fused Pallas kernel.

    state : (B, state_dim) float32
    params: dict with w1 (S,H), b1 (1,H), w2 (H,H), b2 (1,H), w3 (H,1), b3 (1,1)
            (Linear weights stored pre-transposed so each layer is x @ W + b.)
    returns: (B, 1) float32
    """
    B, S = state.shape
    H = params["w1"].shape[1]

    # ---- batch tiling: fixed tile so the pipeline / megacore engage --------
    if batch_tile is None:
        batch_tile = 512                 # h1/h2 f32 intermediates stay small
    if B <= batch_tile:
        bt = _round_up(B, 8)             # single tile: sublane-align only
    else:
        bt = _round_up(batch_tile, 128)  # multi-tile: lane-align output blocks
    b_pad = _round_up(B, bt)
    grid = (b_pad // bt,)

    # ---- operand prep: bf16 for MXU inputs, f32 for everything else -------
    x = state.astype(jnp.bfloat16)
    if b_pad != B:
        x = jnp.pad(x, ((0, b_pad - B), (0, 0)))
    w1 = params["w1"].astype(jnp.bfloat16)
    w2 = params["w2"].astype(jnp.bfloat16)
    b1 = params["b1"].reshape(1, H).astype(jnp.float32)
    b2 = params["b2"].reshape(1, H).astype(jnp.float32)
    w3 = params["w3"].reshape(1, H).astype(jnp.float32)   # row layout for VPU
    b3 = params["b3"].reshape(1).astype(jnp.float32)      # SMEM scalar

    const = lambda shape: pl.BlockSpec(shape, lambda i: (0, 0))

    out_row = pl.pallas_call(
        _value_mlp_kernel,
        out_shape=jax.ShapeDtypeStruct((1, b_pad), jnp.float32),
        grid_spec=pltpu.PrefetchScalarGridSpec(
            num_scalar_prefetch=0,
            grid=grid,
            in_specs=[
                pl.BlockSpec((bt, S), lambda i: (i, 0)),   # state tile
                const((S, H)),                             # w1 (bf16)
                const((1, H)),                             # b1
                const((H, H)),                             # w2 (bf16)
                const((1, H)),                             # b2
                const((1, H)),                             # w3 row
                pl.BlockSpec(memory_space=pltpu.MemorySpace.SMEM),  # b3 scalar
            ],
            out_specs=pl.BlockSpec((1, bt), lambda i: (0, i)),
        ),
        compiler_params=pltpu.CompilerParams(
            dimension_semantics=("parallel",)),  # v7x can split the batch axis
    )(x, w1, b1, w2, b2, w3, b3)

    # (1, B_pad) lane-dense row -> (B, 1) column, dropping padded rows.
    return out_row.reshape(b_pad, 1)[:B]


def _xavier_uniform(key, fan_in, fan_out, gain=1.0):
    # Matches torch.nn.init.xavier_uniform_ for a Linear weight of shape
    # (fan_out, fan_in); we directly build the transposed (fan_in, fan_out).
    bound = gain * math.sqrt(6.0 / (fan_in + fan_out))
    return jax.random.uniform(key, (fan_in, fan_out), jnp.float32,
                              minval=-bound, maxval=bound)


def init_value_network(key, state_dim, hidden_dim=256):
    k1, k2, k3 = jax.random.split(key, 3)
    return {
        "w1": _xavier_uniform(k1, state_dim, hidden_dim),
        "b1": jnp.zeros((1, hidden_dim), jnp.float32),
        "w2": _xavier_uniform(k2, hidden_dim, hidden_dim),
        "b2": jnp.zeros((1, hidden_dim), jnp.float32),
        "w3": _xavier_uniform(k3, hidden_dim, 1),
        "b3": jnp.zeros((1, 1), jnp.float32),
    }


def value_network_reference_f32(state, params):
    h1 = jnp.maximum(state @ params["w1"] + params["b1"], 0.0)
    h2 = jnp.maximum(h1 @ params["w2"] + params["b2"], 0.0)
    return h2 @ params["w3"] + params["b3"]


def value_network_reference_bf16(state, params):
    # Mirrors the kernel's mixed precision exactly (bf16 matmuls, f32 accum).
    x = state.astype(jnp.bfloat16)
    w1 = params["w1"].astype(jnp.bfloat16)
    w2 = params["w2"].astype(jnp.bfloat16)
    h1 = jnp.maximum(
        jnp.dot(x, w1, preferred_element_type=jnp.float32) + params["b1"], 0.0)
    h2 = jnp.maximum(
        jnp.dot(h1.astype(jnp.bfloat16), w2,
                preferred_element_type=jnp.float32) + params["b2"], 0.0)
    v = jnp.sum(h2 * params["w3"].reshape(1, -1), axis=-1, keepdims=True)
    return v + params["b3"]


if __name__ == "__main__":
    key = jax.random.PRNGKey(0)
    kp, kx = jax.random.split(key)

    # Small shapes; batch=200 is deliberately ragged to exercise the
    # pad-to-tile / slice-back path, and batch_tile=128 gives a 2-step grid.
    batch, state_dim, hidden_dim = 200, 16, 32
    params = init_value_network(kp, state_dim, hidden_dim)
    state = jax.random.normal(kx, (batch, state_dim), jnp.float32)

    # Multi-tile path (grid = (2,)).
    value = value_network_forward(state, params, batch_tile=128)
    value = jax.block_until_ready(value)

    # Default-tile path (whole batch in one tile, grid = (1,)).
    value_single = value_network_forward(state, params)
    value_single = jax.block_until_ready(value_single)

    assert value.shape == (batch, 1)
    assert value_single.shape == (batch, 1)

    ref_bf16 = value_network_reference_bf16(state, params)
    ref_f32 = value_network_reference_f32(state, params)

    # Exact-semantics check (same mixed precision as the kernel).
    assert jnp.allclose(value, ref_bf16, atol=1e-3, rtol=1e-3)
    assert jnp.allclose(value_single, ref_bf16, atol=1e-3, rtol=1e-3)
    # Looser check against the pure-f32 PyTorch-equivalent math.
    assert jnp.allclose(value, ref_f32, atol=5e-2, rtol=5e-2)

    print("KERNEL_OK")
</pallas_src>

<mosaic_0001>
module attributes {stable_mosaic.version = 11 : i64} {
  func.func @_value_mlp_kernel(%arg0: i32, %arg1: memref<128x16xbf16, #tpu.memory_space<vmem>>, %arg2: memref<16x32xbf16, #tpu.memory_space<vmem>>, %arg3: memref<1x32xf32, #tpu.memory_space<vmem>>, %arg4: memref<32x32xbf16, #tpu.memory_space<vmem>>, %arg5: memref<1x32xf32, #tpu.memory_space<vmem>>, %arg6: memref<1x32xf32, #tpu.memory_space<vmem>>, %arg7: memref<1xf32, #tpu.memory_space<smem>>, %arg8: memref<1x128xf32, #tpu.memory_space<vmem>>) attributes {dimension_semantics = [#tpu.dimension_semantics<parallel>], iteration_bounds = array<i64: 2>, scalar_prefetch = 0 : i64, scratch_operands = 0 : i64, tpu.core_type = #tpu.core_type<tc>, window_params = [{transform_indices = @transform_0, window_bounds = array<i64: 128, 16>}, {pipeline_mode = #tpu.pipeline_mode<synchronous>, transform_indices = @transform_1, window_bounds = array<i64: 16, 32>}, {pipeline_mode = #tpu.pipeline_mode<synchronous>, transform_indices = @transform_2, window_bounds = array<i64: 1, 32>}, {pipeline_mode = #tpu.pipeline_mode<synchronous>, transform_indices = @transform_3, window_bounds = array<i64: 32, 32>}, {pipeline_mode = #tpu.pipeline_mode<synchronous>, transform_indices = @transform_4, window_bounds = array<i64: 1, 32>}, {pipeline_mode = #tpu.pipeline_mode<synchronous>, transform_indices = @transform_5, window_bounds = array<i64: 1, 32>}, {transform_indices = @transform_6, window_bounds = array<i64: 1>}, {transform_indices = @transform_7, window_bounds = array<i64: 1, 128>}]} {
    %c0 = arith.constant 0 : index
    %c0_0 = arith.constant 0 : index
    %0 = vector.load %arg1[%c0, %c0_0] : memref<128x16xbf16, #tpu.memory_space<vmem>>, vector<128x16xbf16>
    %c0_1 = arith.constant 0 : index
    %c0_2 = arith.constant 0 : index
    %1 = vector.load %arg2[%c0_1, %c0_2] : memref<16x32xbf16, #tpu.memory_space<vmem>>, vector<16x32xbf16>
    %cst = arith.constant dense<0.000000e+00> : vector<128x32xf32>
    %2 = tpu.matmul %0, %1, %cst {dimension_numbers = #tpu.dot_dimension_numbers<[1], [0], [0], [1], [0, 0, 1, 1], [], []>} : vector<128x16xbf16>, vector<16x32xbf16>, vector<128x32xf32> -> vector<128x32xf32>
    %c0_3 = arith.constant 0 : index
    %c0_4 = arith.constant 0 : index
    %3 = vector.load %arg3[%c0_3, %c0_4] : memref<1x32xf32, #tpu.memory_space<vmem>>, vector<1x32xf32>
    %4 = vector.broadcast %3 : vector<1x32xf32> to vector<128x32xf32>
    %5 = arith.addf %2, %4 : vector<128x32xf32>
    %cst_5 = arith.constant 0.000000e+00 : f32
    %6 = vector.broadcast %cst_5 : f32 to vector<128x32xf32>
    %7 = arith.maximumf %5, %6 : vector<128x32xf32>
    %8 = arith.truncf %7 : vector<128x32xf32> to vector<128x32xbf16>
    %c0_6 = arith.constant 0 : index
    %c0_7 = arith.constant 0 : index
    %9 = vector.load %arg4[%c0_6, %c0_7] : memref<32x32xbf16, #tpu.memory_space<vmem>>, vector<32x32xbf16>
    %cst_8 = arith.constant dense<0.000000e+00> : vector<128x32xf32>
    %10 = tpu.matmul %8, %9, %cst_8 {dimension_numbers = #tpu.dot_dimension_numbers<[1], [0], [0], [1], [0, 0, 1, 1], [], []>} : vector<128x32xbf16>, vector<32x32xbf16>, vector<128x32xf32> -> vector<128x32xf32>
    %c0_9 = arith.constant 0 : index
    %c0_10 = arith.constant 0 : index
    %11 = vector.load %arg5[%c0_9, %c0_10] : memref<1x32xf32, #tpu.memory_space<vmem>>, vector<1x32xf32>
    %12 = vector.broadcast %11 : vector<1x32xf32> to vector<128x32xf32>
    %13 = arith.addf %10, %12 : vector<128x32xf32>
    %cst_11 = arith.constant 0.000000e+00 : f32
    %14 = vector.broadcast %cst_11 : f32 to vector<128x32xf32>
    %15 = arith.maximumf %13, %14 : vector<128x32xf32>
    %c0_12 = arith.constant 0 : index
    %c0_13 = arith.constant 0 : index
    %16 = vector.load %arg6[%c0_12, %c0_13] : memref<1x32xf32, #tpu.memory_space<vmem>>, vector<1x32xf32>
    %17 = vector.broadcast %16 : vector<1x32xf32> to vector<128x32xf32>
    %18 = arith.mulf %15, %17 : vector<128x32xf32>
    %cst_14 = arith.constant dense<0.000000e+00> : vector<128xf32>
    %19 = vector.multi_reduction <add>, %18, %cst_14 [1] : vector<128x32xf32> to vector<128xf32>
    %c0_15 = arith.constant 0 : index
    %20 = memref.load %arg7[%c0_15] : memref<1xf32, #tpu.memory_space<smem>>
    %21 = vector.broadcast %20 : f32 to vector<128xf32>
    %22 = arith.addf %19, %21 : vector<128xf32>
    %23 = vector.shape_cast %22 : vector<128xf32> to vector<1x128xf32>
    %c0_16 = arith.constant 0 : index
    %c0_17 = arith.constant 0 : index
    %24 = vector.load %arg8[%c0_16, %c0_17] : memref<1x128xf32, #tpu.memory_space<vmem>>, vector<1x128xf32>
    tpu.vector_store %arg8[%c0_16, %c0_17], %23 {strides = array<i32>} : memref<1x128xf32, #tpu.memory_space<vmem>>, vector<1x128xf32>,
    return
  }
  func.func @transform_0(%arg0: i32) -> (i32, i32) {
    %c0_i32 = arith.constant 0 : i32
    %c0_i32_0 = arith.constant 0 : i32
    return %arg0, %c0_i32 : i32, i32
  }
  func.func @transform_1(%arg0: i32) -> (i32, i32) {
    %c0_i32 = arith.constant 0 : i32
    %c0_i32_0 = arith.constant 0 : i32
    %c0_i32_1 = arith.constant 0 : i32
    return %c0_i32, %c0_i32_0 : i32, i32
  }
  func.func @transform_2(%arg0: i32) -> (i32, i32) {
    %c0_i32 = arith.constant 0 : i32
    %c0_i32_0 = arith.constant 0 : i32
    %c0_i32_1 = arith.constant 0 : i32
    return %c0_i32, %c0_i32_0 : i32, i32
  }
  func.func @transform_3(%arg0: i32) -> (i32, i32) {
    %c0_i32 = arith.constant 0 : i32
    %c0_i32_0 = arith.constant 0 : i32
    %c0_i32_1 = arith.constant 0 : i32
    return %c0_i32, %c0_i32_0 : i32, i32
  }
  func.func @transform_4(%arg0: i32) -> (i32, i32) {
    %c0_i32 = arith.constant 0 : i32
    %c0_i32_0 = arith.constant 0 : i32
    %c0_i32_1 = arith.constant 0 : i32
    return %c0_i32, %c0_i32_0 : i32, i32
  }
  func.func @transform_5(%arg0: i32) -> (i32, i32) {
    %c0_i32 = arith.constant 0 : i32
    %c0_i32_0 = arith.constant 0 : i32
    %c0_i32_1 = arith.constant 0 : i32
    return %c0_i32, %c0_i32_0 : i32, i32
  }
  func.func @transform_6(%arg0: i32) -> i32 {
    %c0_i32 = arith.constant 0 : i32
    %c0_i32_0 = arith.constant 0 : i32
    return %c0_i32 : i32
  }
  func.func @transform_7(%arg0: i32) -> (i32, i32) {
    %c0_i32 = arith.constant 0 : i32
    %c0_i32_0 = arith.constant 0 : i32
    return %c0_i32, %arg0 : i32, i32
  }
}

</mosaic_0001>

<bundles_post_ra>
// kernel: tpu_custom_call.1
= control target key start
LH: loop header
LB: loop body
LE: loop exit
PB: predicated region body
PF: predicated region fallthrough
CT: control target
= control target key end

     0   :  { %s1446_s0 = inlined_call_operand.vmem [shape: bf16[256,16], index: 0, kind: input, shape index: {}]   ;;  %s1447_s1 = inlined_call_operand.vmem [shape: bf16[16,32], index: 1, kind: input, shape index: {}]   ;;  %s1448_s2 = inlined_call_operand.vmem [shape: f32[1,32], index: 2, kind: input, shape index: {}]   ;;  %s1449_s3 = inlined_call_operand.vmem [shape: bf16[32,32], index: 3, kind: input, shape index: {}]   ;;  %s1450_s4 = inlined_call_operand.vmem [shape: f32[1,32], index: 4, kind: input, shape index: {}]   ;;  %s1451_s5 = inlined_call_operand.vmem [shape: f32[1,32], index: 5, kind: input, shape index: {}]   ;;  %s1452_s6 = inlined_call_operand.<no memory space> [shape: f32[1], index: 6, kind: input, shape index: {}]   ;;  %s1453_s7 = inlined_call_operand.hbm [shape: f32[1,256], index: 7, kind: output, shape index: {}]  }
   0x1   :  { %12 = sst [smem:[#allocation2]] %s1452_s6 }
   0x2   :  { %13 = vsyncpa [#allocation4], 0 }
   0x3   :  { %15 = vsyncpa [#allocation4 + $0x1], 0  ;;  %s1198_s26 = smov 0   ;;  %s1200_s27 = smov 0  }
   0x4   :  { %s1202_s28 = smov 0   ;;  %s1204_s29 = smov 0  }
   0x5 LB: > { %s943_s6 = sadd.s32 4294967295, %s1152_s29   ;;  %s944_s30 = sadd.s32 4294967294, %s1152_s29   ;;  %s1152_s29 = sphi %s1204_s29, %s1459_s29   ;;  %s1148_s28 = sphi %s1202_s28, %s1458_s28   ;;  %s1144_s27 = sphi %s1200_s27, %s1457_s27   ;;  %s1140_s26 = sphi %s1198_s26, %s1456_s26  }
   0x6   : > { %s1221_s8 = sadd.s32 1, %s1152_s29   ;;  %s180_s9 = sadd.s32 1, %s1148_s28 }
   0x7   : > { %s177_s10 = ssub.s32 %s1152_s29, %s1221_s8  ;;  %p190_p0 = scmp.ne.s32.totalorder %s1148_s28, %s1144_s27 }
   0x8   : > { %p178_p1 = scmp.eq.s32.totalorder %s177_s10, 0  ;;  %p191_p2 = scmp.eq.s32.totalorder %s943_s6, 1 }
   0x9   : > { %p196_p3 = scmp.ne.s32.totalorder %s1144_s27, %s1140_s26  ;;  %p197_p4 = scmp.eq.s32.totalorder %s944_s30, 1 }
   0xa   : > { %s1231_s11 = scalar_select %p178_p1, %s1148_s28, %s180_s9  }
   0xb   : > { %p1233_p5 = por %p191_p2, %p190_p0  ;;  %p1237_p6 = por %p197_p4, %p196_p3 }
   0xc   : > { %p947_p7 = scmp.ge.s32.totalorder %s1152_s29, 1  ;;  %p242_p8 = scmp.lt.s32.totalorder %s1152_s29, 3 }
   0xe   : > { %p243_p9 = pnand %p947_p7, %p242_p8 }
   0xf   : > { %v1079_v0 = vld [vmem:[%s1447_s1] sm:$0xff] (!%p243_p9)   ;;  %s1246_s16 = sshll.u32 (!%p243_p9), %s943_s6, 4  ;;  %vm351_vm0 = vcmask (!%p243_p9), 130048   ;;  %v1089_v10 = vld [vmem:[%s1449_s3 + $0x8] sm:$0xff] (!%p243_p9)   ;;  %vm520_vm1 = vcmask (!%p243_p9), 261120   ;;  %vm774_vm2 = vcmask (!%p243_p9), 130112  }
  0x10   : > { %246 = sbr.rel (%p243_p9) target bundleno = 662 (0x296), region = 48  ;;  %p274_p10 = scmp.lt.s32.totalorder (!%p243_p9), %s1246_s16, 31  ;;  %1002 = vmatprep.subr.bf16.mxu0 (!%p243_p9), %v1079_v0  ;;  %v1088_v9 = vld [vmem:[%s1449_s3] sm:$0xff] (!%p243_p9)   ;;  %vm781_vm3 = vcmask (!%p243_p9), 195712   ;;  %vm788_vm4 = vcmask (!%p243_p9), 261312   ;;  %vm795_vm5 = vcmask (!%p243_p9), 326912  }
  0x11   : > { %1003 = vmatpush3.bf16.msra.mxu0 (!%p243_p9), %v1079_v0  ;;  %1020 = vmatprep.subr.bf16.mxu1 (!%p243_p9), %v1088_v9  ;;  %v950_v11 = vld [vmem:[%s1448_s2] ss:$0 sm:$0xff] (!%p243_p9)  ;;  %vm802_vm6 = vcmask (!%p243_p9), 392512   ;;  %vm809_vm7 = vcmask (!%p243_p9), 458112   ;;  %vm816_vm8 = vcmask (!%p243_p9), 523712   ;;  %vm823_vm9 = vcmask (!%p243_p9), 589312   ;;  %s1402_s23 = scalar_lea.hbm (!%p243_p9), %s1453_s7, %s1246_s16 }
  0x12   : > { %1021 = vmatpush3.bf16.msra.mxu1 (!%p243_p9), %v1088_v9  ;;  %vm830_vm10 = vcmask (!%p243_p9), 654912   ;;  %vm837_vm11 = vcmask (!%p243_p9), 720512   ;;  %vm844_vm12 = vcmask (!%p243_p9), 786112   ;;  %vm851_vm13 = vcmask (!%p243_p9), 851712   ;;  %s1154_s6 = smov (!%p243_p9), [#allocation3]  }
  0x13   : > { %1022 = vmatprep.subr.bf16.mxu1 (!%p243_p9), %v1089_v10  ;;  %vm858_vm14 = vcmask (!%p243_p9), 917312   ;;  %vm865_vm15 = vcmask (!%p243_p9), 982912   ;;  %s1094_s30 = sshll.u32 (!%p243_p9), %s1154_s6, 4  ;;  %s1095_s30 = int_to_ptr.vmem [resolvable:$false] %s1094_s30 }
  0x14   : > { %s1096_s9 = scalar_lea.vmem (!%p243_p9), %s1095_s30, 32 }
  0x16   : > { %1023 = vmatpush3.bf16.msra.mxu1 (!%p243_p9), %v1089_v10  ;;  %v1288_v10 = vld [vmem:[%s1451_s5] ss:$0 sm:$0xff] (!%p243_p9) }
  0x17   : > { %s275_s17 = scalar_select %p274_p10, %s1246_s16, 31 }
  0x19   : > { %s949_s18 = sshll.u32 %s275_s17, 2  ;;  %s729_s17 = sld [smem:[#allocation2]] }
  0x1a   : > { %s277_s21 = scalar_lea.vmem %s1446_s0, %s949_s18  ;;  %s271_s18 = sand.u32 1, %s1144_s27  }
  0x1b   : > { %v1080_v1 = vld [vmem:[%s277_s21] sm:$0xff]   ;;  %v1081_v2 = vld [vmem:[%s277_s21 + $0x8] sm:$0xff]   ;;  %v1082_v3 = vld [vmem:[%s277_s21 + $0x10] sm:$0xff]   ;;  %s272_s19 = scalar_lea.vmem [#allocation3], %s271_s18  ;;  %s877_s24 = scalar_lea.sflag [#allocation4], %s271_s18 }
  0x1c   : > { %1004 = vmatprep.mubr.msk.bf16.mxu0 %vm351_vm0, %v1080_v1  ;;  %v1083_v4 = vld [vmem:[%s277_s21 + $0x18] sm:$0xff]   ;;  %v1084_v5 = vld [vmem:[%s277_s21 + $0x20] sm:$0xff]   ;;  %v1085_v6 = vld [vmem:[%s277_s21 + $0x28] sm:$0xff]   ;;  %s889_s20 = sshll.u32 %s272_s19, 4  ;;  %s1404_s20 = int_to_ptr.vmem [resolvable:$true] %s889_s20 }
  0x1d   : > { %1005 = vmatmul.mubr.msk.bf16.vlgmr.msra.gmra.mrb[0].mxu0 %vm351_vm0, %v1081_v2  ;;  %v1086_v7 = vld [vmem:[%s277_s21 + $0x30] sm:$0xff]   ;;  %v1087_v8 = vld [vmem:[%s277_s21 + $0x38] sm:$0xff]   ;;  %s1090_s25 = scalar_lea.vmem %s1404_s20, 16  ;;  %p1097_p0 = scmp.lt.s32.totalorder %s1404_s20, %s1095_s30 }
  0x1e   : > { %1008 = vmatprep.mubr.msk.bf16.mxu0 %vm351_vm0, %v1082_v3  ;;  %p1091_p11 = scmp.ne.s32.totalorder %s1404_s20, %s1090_s25  ;;  %p1098_p1 = scmp.lt.s32.totalorder %s1096_s9, %s1090_s25 }
  0x20   : > { %p1092_p12 = pnand %p1091_p11, %p1233_p5  ;;  %p1099_p2 = por %p1098_p1, %p1097_p0 }
  0x22   : > { %p1093_p13 = pneg %p1092_p12 }
  0x24   : > { %p1100_p3 = pnand %p1099_p2, %p1093_p13 }
  0x25   : > { %1009 = vmatmul.mubr.msk.bf16.gmra.mrb[4].mxu0 %vm351_vm0, %v1083_v4  ;;  %v1281_v4 = vld [vmem:[%s1450_s4] ss:$0 sm:$0xff] }
  0x26   : > { %1012 = vmatprep.mubr.msk.bf16.mxu0 %vm351_vm0, %v1084_v5 }
  0x2d   : > { %1013 = vmatmul.mubr.msk.bf16.gmra.mrb[8].mxu0 %vm351_vm0, %v1085_v6 }
  0x2e   : > { %1016 = vmatprep.mubr.msk.bf16.mxu0 %vm351_vm0, %v1086_v7 }
  0x35   : > { %1017 = vmatmul.mubr.msk.bf16.gmra.mrb[12].mxu0 %vm351_vm0, %v1087_v8  ;;  %vm872_vm0 = vcmask 1048512  }
  0xf0   : > { %v1006_v12 = vpop.f32.mrb[0].mxu0 }
  0xf1   : > { %v419_v13 = vadd.f32 %v1006_v12, %v950_v11  ;;  %v410_v14 = vpop.f32.mrb[1].mxu0 }
  0xf2   : > { %v411_v15 = vadd.f32 %v950_v11, %v410_v14  ;;  %v1007_v16 = vpop.f32.mrb[2].mxu0 }
  0xf3   : > { %v422_v17 = vadd.f32 %v1007_v16, %v950_v11  ;;  %v413_v18 = vpop.f32.mrb[3].mxu0  ;;  %v475_v20 = vmax.f32 %v419_v13, 0.0 }
  0xf4   : > { %v414_v19 = vadd.f32 %v950_v11, %v413_v18  ;;  %v473_v22 = vmax.f32 %v411_v15, 0.0 }
  0xf5   : > { %v476_v21 = vmax.f32 %v422_v17, 0.0 }
  0xf6   : > { %v474_v23 = vmax.f32 %v414_v19, 0.0 }
  0xf7   : > { %v490_v24 = vpack.c.bf16 %v476_v21, %v475_v20 }
  0xf8   : > { %v1010_v25 = vpop.f32.mrb[4].mxu0  ;;  %v489_v26 = vpack.c.bf16 %v474_v23, %v473_v22 }
  0xf9   : > { %v435_v27 = vadd.f32 %v1010_v25, %v950_v11  ;;  %v426_v28 = vpop.f32.mrb[5].mxu0 }
  0xfa   : > { %v427_v29 = vadd.f32 %v950_v11, %v426_v28  ;;  %v1011_v30 = vpop.f32.mrb[6].mxu0  ;;  %1024 = vmatprep.mubr.msk.bf16.mxu1 %vm520_vm1, %v489_v26 }
  0xfb   : > { %v438_v31 = vadd.f32 %v1011_v30, %v950_v11  ;;  %v429_v32 = vpop.f32.mrb[7].mxu0  ;;  %1025 = vmatmul.mubr.msk.bf16.vlgmr.msra.gmra.mrb[0].mxu1 %vm520_vm1, %v490_v24  ;;  %v479_v34 = vmax.f32 %v435_v27, 0.0 }
  0xfc   : > { %v430_v33 = vadd.f32 %v950_v11, %v429_v32  ;;  %v477_v36 = vmax.f32 %v427_v29, 0.0 }
  0xfd   : > { %v480_v35 = vmax.f32 %v438_v31, 0.0 }
  0xfe   : > { %v478_v37 = vmax.f32 %v430_v33, 0.0 }
  0xff   : > { %v492_v38 = vpack.c.bf16 %v480_v35, %v479_v34 }
 0x100   : > { %v491_v39 = vpack.c.bf16 %v478_v37, %v477_v36  ;;  %v1014_v40 = vpop.f32.mrb[8].mxu0 }
 0x101   : > { %v451_v41 = vadd.f32 %v1014_v40, %v950_v11  ;;  %v442_v42 = vpop.f32.mrb[9].mxu0 }
 0x102   : > { %v443_v43 = vadd.f32 %v950_v11, %v442_v42  ;;  %v1015_v44 = vpop.f32.mrb[10].mxu0  ;;  %1028 = vmatprep.mubr.msk.bf16.mxu1 %vm520_vm1, %v491_v39 }
 0x103   : > { %v454_v45 = vadd.f32 %v1015_v44, %v950_v11  ;;  %v445_v46 = vpop.f32.mrb[11].mxu0  ;;  %1029 = vmatmul.mubr.msk.bf16.gmra.mrb[4].mxu1 %vm520_vm1, %v492_v38  ;;  %v483_v48 = vmax.f32 %v451_v41, 0.0 }
 0x104   : > { %v446_v47 = vadd.f32 %v950_v11, %v445_v46  ;;  %v481_v50 = vmax.f32 %v443_v43, 0.0 }
 0x105   : > { %v484_v49 = vmax.f32 %v454_v45, 0.0 }
 0x106   : > { %v482_v51 = vmax.f32 %v446_v47, 0.0 }
 0x107   : > { %v494_v52 = vpack.c.bf16 %v484_v49, %v483_v48 }
 0x108   : > { %v493_v53 = vpack.c.bf16 %v482_v51, %v481_v50  ;;  %v1018_v54 = vpop.f32.mrb[12].mxu0 }
 0x109   : > { %v467_v55 = vadd.f32 %v1018_v54, %v950_v11  ;;  %v458_v56 = vpop.f32.mrb[13].mxu0 }
 0x10a   : > { %v459_v57 = vadd.f32 %v950_v11, %v458_v56  ;;  %v1019_v58 = vpop.f32.mrb[14].mxu0  ;;  %1032 = vmatprep.mubr.msk.bf16.mxu1 %vm520_vm1, %v493_v53 }
 0x10b   : > { %v470_v59 = vadd.f32 %v1019_v58, %v950_v11  ;;  %v461_v60 = vpop.f32.mrb[15].mxu0  ;;  %1033 = vmatmul.mubr.msk.bf16.gmra.mrb[8].mxu1 %vm520_vm1, %v494_v52  ;;  %v487_v62 = vmax.f32 %v467_v55, 0.0 }
 0x10c   : > { %v462_v61 = vadd.f32 %v950_v11, %v461_v60  ;;  %v485_v0 = vmax.f32 %v459_v57, 0.0 }
 0x10d   : > { %v488_v63 = vmax.f32 %v470_v59, 0.0 }
 0x10e   : > { %v486_v1 = vmax.f32 %v462_v61, 0.0 }
 0x10f   : > { %v496_v2 = vpack.c.bf16 %v488_v63, %v487_v62 }
 0x110   : > { %v495_v3 = vpack.c.bf16 %v486_v1, %v485_v0 }
 0x112   : > { %1036 = vmatprep.mubr.msk.bf16.mxu1 %vm520_vm1, %v495_v3 }
 0x113   : > { %1037 = vmatmul.mubr.msk.bf16.gmra.mrb[12].mxu1 %vm520_vm1, %v496_v2 }
 0x1ce   : > { %v1026_v5 = vpop.f32.mrb[0].mxu1 }
 0x1cf   : > { %v588_v6 = vadd.f32 %v1026_v5, %v1281_v4  ;;  %v579_v7 = vpop.f32.mrb[1].mxu1 }
 0x1d0   : > { %v580_v8 = vadd.f32 %v1281_v4, %v579_v7  ;;  %v1027_v9 = vpop.f32.mrb[2].mxu1 }
 0x1d1   : > { %v644_v11 = vmax.f32 %v588_v6, 0.0  ;;  %v591_v12 = vadd.f32 %v1027_v9, %v1281_v4  ;;  %v582_v13 = vpop.f32.mrb[3].mxu1 }
 0x1d2   : > { %v642_v14 = vmax.f32 %v580_v8, 0.0  ;;  %v583_v15 = vadd.f32 %v1281_v4, %v582_v13 }
 0x1d3   : > { %v645_v16 = vmax.f32 %v591_v12, 0.0  ;;  %v667_v17 = vmul.f32 %v1288_v10, %v644_v11 }
 0x1d4   : > { %v643_v18 = vmax.f32 %v583_v15, 0.0  ;;  %v665_v19 = vmul.f32 %v1288_v10, %v642_v14 }
 0x1d5   : > { %v687_v20 = vsel %vm520_vm1, %v667_v17, 0.0  ;;  %v668_v21 = vmul.f32 %v1288_v10, %v645_v16 }
 0x1d6   : > { %688 = vadd.xlane.f32.xlu1 %v687_v20  ;;  %v1030_v22 = vpop.f32.mrb[4].mxu1  ;;  %v681_v23 = vsel %vm520_vm1, %v665_v19, 0.0  ;;  %v666_v24 = vmul.f32 %v1288_v10, %v643_v18 }
 0x1d7   : > { %v604_v25 = vadd.f32 %v1030_v22, %v1281_v4  ;;  %v595_v26 = vpop.f32.mrb[5].mxu1  ;;  %682 = vadd.xlane.f32.xlu0 %v681_v23  ;;  %v690_v32 = vsel %vm520_vm1, %v668_v21, 0.0  ;;  %v763_v23 = vlaneseq }
 0x1d8   : > { %v596_v27 = vadd.f32 %v1281_v4, %v595_v26  ;;  %v1031_v28 = vpop.f32.mrb[6].mxu1  ;;  %v684_v35 = vsel %vm520_vm1, %v666_v24, 0.0 }
 0x1d9   : > { %v648_v29 = vmax.f32 %v604_v25, 0.0  ;;  %v607_v30 = vadd.f32 %v1031_v28, %v1281_v4  ;;  %v598_v31 = vpop.f32.mrb[7].mxu1  ;;  %v1336_v24 = vand.u32 127, %v763_v23 }
 0x1da   : > { %v646_v33 = vmax.f32 %v596_v27, 0.0  ;;  %v599_v34 = vadd.f32 %v1281_v4, %v598_v31  ;;  %691 = vadd.xlane.f32.xlu1 %v690_v32  ;;  %v1339_v27 = vshrl.u32 %v763_v23, 7 }
 0x1db   : > { %v649_v36 = vmax.f32 %v607_v30, 0.0  ;;  %685 = vadd.xlane.f32.xlu0 %v684_v35  ;;  %v671_v37 = vmul.f32 %v1288_v10, %v648_v29  ;;  %v769_v26 = vadd.s32 4294967288, %v1336_v24  ;;  %v1341_v29 = vstv %s729_s17 }
 0x1dc   : > { %v647_v38 = vmax.f32 %v599_v34, 0.0  ;;  %v669_v42 = vmul.f32 %v1288_v10, %v646_v33  ;;  %v767_v31 = vsub.s32 %v1336_v24, %v1339_v27 }
 0x1dd   : > { %v699_v39 = vsel %vm520_vm1, %v671_v37, 0.0  ;;  %v672_v40 = vmul.f32 %v1288_v10, %v649_v36  ;;  %v772_v30 = vsub.s32 %v769_v26, %v1339_v27  ;;  %v783_v37 = vadd.s32 4294967272, %v1336_v24 }
 0x1de   : > { %v1034_v41 = vpop.f32.mrb[8].mxu1  ;;  %v670_v46 = vmul.f32 %v1288_v10, %v647_v38  ;;  %v693_v54 = vsel %vm520_vm1, %v669_v42, 0.0 }
 0x1df   : > { %v620_v43 = vadd.f32 %v1034_v41, %v1281_v4  ;;  %v611_v44 = vpop.f32.mrb[9].mxu1  ;;  %700 = vadd.xlane.f32.xlu0 %v699_v39  ;;  %v702_v45 = vsel %vm520_vm1, %v672_v40, 0.0  ;;  %v790_v40 = vadd.s32 4294967264, %v1336_v24 }
 0x1e0   : > { %v612_v47 = vadd.f32 %v1281_v4, %v611_v44  ;;  %703 = vadd.xlane.f32.xlu1 %v702_v45  ;;  %v1035_v48 = vpop.f32.mrb[10].mxu1  ;;  %v696_v56 = vsel %vm520_vm1, %v670_v46, 0.0  ;;  %v804_v44 = vadd.s32 4294967248, %v1336_v24  ;;  %v786_v46 = vsub.s32 %v783_v37, %v1339_v27 }
 0x1e1   : > { %v652_v49 = vmax.f32 %v620_v43, 0.0  ;;  %v623_v50 = vadd.f32 %v1035_v48, %v1281_v4  ;;  %v614_v51 = vpop.f32.mrb[11].mxu1  ;;  %v797_v43 = vadd.s32 4294967256, %v1336_v24 }
 0x1e2   : > { %v650_v52 = vmax.f32 %v612_v47, 0.0  ;;  %v615_v53 = vadd.f32 %v1281_v4, %v614_v51  ;;  %v811_v51 = vadd.s32 4294967240, %v1336_v24 }
 0x1e3   : > { %v653_v55 = vmax.f32 %v623_v50, 0.0  ;;  %694 = vadd.xlane.f32.xlu0 %v693_v54  ;;  %v675_v57 = vmul.f32 %v1288_v10, %v652_v49  ;;  %v793_v50 = vsub.s32 %v790_v40, %v1339_v27 }
 0x1e4   : > { %v651_v58 = vmax.f32 %v615_v53, 0.0  ;;  %697 = vadd.xlane.f32.xlu1 %v696_v56  ;;  %v673_v62 = vmul.f32 %v1288_v10, %v650_v52  ;;  %v800_v53 = vsub.s32 %v797_v43, %v1339_v27 }
 0x1e5   : > { %v711_v59 = vsel %vm520_vm1, %v675_v57, 0.0  ;;  %v676_v60 = vmul.f32 %v1288_v10, %v653_v55  ;;  %v807_v55 = vsub.s32 %v804_v44, %v1339_v27 }
 0x1e6   : > { %v1038_v61 = vpop.f32.mrb[12].mxu1  ;;  %v674_v2 = vmul.f32 %v1288_v10, %v651_v58  ;;  %v705_v12 = vsel %vm520_vm1, %v673_v62, 0.0 }
 0x1e7   : > { %v636_v63 = vadd.f32 %v1038_v61, %v1281_v4  ;;  %v627_v0 = vpop.f32.mrb[13].mxu1  ;;  %712 = vadd.xlane.f32.xlu0 %v711_v59  ;;  %v714_v1 = vsel %vm520_vm1, %v676_v60, 0.0  ;;  %v832_v60 = vadd.s32 4294967216, %v1336_v24 }
 0x1e8   : > { %v628_v3 = vadd.f32 %v1281_v4, %v627_v0  ;;  %v1039_v5 = vpop.f32.mrb[14].mxu1  ;;  %715 = vadd.xlane.f32.xlu1 %v714_v1  ;;  %v708_v13 = vsel %vm520_vm1, %v674_v2, 0.0 }
 0x1e9   : > { %v639_v6 = vadd.f32 %v1039_v5, %v1281_v4  ;;  %v630_v7 = vpop.f32.mrb[15].mxu1  ;;  %v656_v8 = vmax.f32 %v636_v63, 0.0  ;;  %v818_v63 = vadd.s32 4294967232, %v1336_v24  ;;  %v825_v5 = vadd.s32 4294967224, %v1336_v24 }
 0x1ea   : > { %v654_v9 = vmax.f32 %v628_v3, 0.0  ;;  %v631_v11 = vadd.f32 %v1281_v4, %v630_v7  ;;  %v839_v3 = vadd.s32 4294967208, %v1336_v24 }
 0x1eb   : > { %706 = vadd.xlane.f32.xlu0 %v705_v12  ;;  %v657_v14 = vmax.f32 %v639_v6, 0.0  ;;  %v679_v19 = vmul.f32 %v1288_v10, %v656_v8  ;;  %v814_v8 = vsub.s32 %v811_v51, %v1339_v27 }
 0x1ec   : > { %v655_v15 = vmax.f32 %v631_v11, 0.0  ;;  %709 = vadd.xlane.f32.xlu1 %v708_v13  ;;  %v677_v16 = vmul.f32 %v1288_v10, %v654_v9  ;;  %v835_v13 = vsub.s32 %v832_v60, %v1339_v27 }
 0x1ed   : > { %v680_v4 = vmul.f32 %v1288_v10, %v657_v14  ;;  %v723_v21 = vsel %vm520_vm1, %v679_v19, 0.0  ;;  %v821_v14 = vsub.s32 %v818_v63, %v1339_v27  ;;  %v853_v19 = vadd.s32 4294967192, %v1336_v24 }
 0x1ee   : > { %v717_v17 = vsel %vm520_vm1, %v677_v16, 0.0  ;;  %v678_v18 = vmul.f32 %v1288_v10, %v655_v15  ;;  %v776_v10 = vadd.s32 4294967280, %v1336_v24  ;;  %v846_v15 = vadd.s32 4294967200, %v1336_v24 }
 0x1ef   : > { %718 = vadd.xlane.f32.xlu0 %v717_v17  ;;  %v726_v22 = vsel %vm520_vm1, %v680_v4, 0.0  ;;  %v842_v16 = vsub.s32 %v839_v3, %v1339_v27 }
 0x1f0   : > { %v720_v20 = vsel %vm520_vm1, %v678_v18, 0.0  ;;  %v779_v36 = vsub.s32 %v776_v10, %v1339_v27  ;;  %v828_v18 = vsub.s32 %v825_v5, %v1339_v27  ;;  %v849_v10 = vsub.s32 %v846_v15, %v1339_v27 }
 0x1f1   : > { %721 = vadd.xlane.f32.xlu1 %v720_v20 }
 0x1f3   : > { %724 = vadd.xlane.f32.xlu0 %v723_v21 }
 0x1f5   : > { %727 = vadd.xlane.f32.xlu1 %v726_v22 }
 0x263   : > { %v689_v25 = vpop.xlane.xlu1 %688 }
 0x264   : > { %v683_v28 = vpop.xlane.xlu0 %682  ;;  %v733_v38 = vadd.f32 %v1341_v29, %v689_v25 }
 0x265   : > { %v731_v32 = vadd.f32 %v1341_v29, %v683_v28 }
 0x266   : > { %v780_v49 = vrot.slane %v733_v38, %v779_v36  ;;  %v867_v38 = vadd.s32 4294967176, %v1336_v24 }
 0x267   : > { %v692_v34 = vpop.xlane.xlu1 %691  ;;  %v768_v41 = vrot.slane %v731_v32, %v767_v31 }
 0x268   : > { %v686_v33 = vpop.xlane.xlu0 %685  ;;  %v734_v47 = vadd.f32 %v1341_v29, %v692_v34  ;;  %v856_v34 = vsub.s32 %v853_v19, %v1339_v27 }
 0x269   : > { %v732_v35 = vadd.f32 %v1341_v29, %v686_v33 }
 0x26a   : > { %v787_v58 = vrot.slane %v734_v47, %v786_v46 }
 0x26b   : > { %v773_v39 = vrot.slane %v732_v35, %v772_v30  ;;  %v860_v30 = vadd.s32 4294967184, %v1336_v24 }
 0x26c   : > { %v701_v42 = vpop.xlane.xlu0 %700 }
 0x26d   : > { %v704_v45 = vpop.xlane.xlu1 %703  ;;  %v775_v48 = vsel %vm774_vm2, %v773_v39, %v768_v41  ;;  %v737_v61 = vadd.f32 %v1341_v29, %v701_v42 }
 0x26e   : > { %v782_v54 = vsel %vm781_vm3, %v780_v49, %v775_v48  ;;  %v738_v9 = vadd.f32 %v1341_v29, %v704_v45  ;;  %v863_v45 = vsub.s32 %v860_v30, %v1339_v27 }
 0x26f   : > { %v789_v0 = vsel %vm788_vm4, %v787_v58, %v782_v54  ;;  %v808_v12 = vrot.slane %v737_v61, %v807_v55 }
 0x270   : > { %v695_v52 = vpop.xlane.xlu0 %694  ;;  %v815_v23 = vrot.slane %v738_v9, %v814_v8 }
 0x271   : > { %v735_v56 = vadd.f32 %v1341_v29, %v695_v52  ;;  %v698_v57 = vpop.xlane.xlu1 %697 }
 0x272   : > { %v736_v59 = vadd.f32 %v1341_v29, %v698_v57 }
 0x273   : > { %v794_v62 = vrot.slane %v735_v56, %v793_v50  ;;  %v870_v50 = vsub.s32 %v867_v38, %v1339_v27 }
 0x274   : > { %v801_v1 = vrot.slane %v736_v59, %v800_v53  ;;  %v713_v2 = vpop.xlane.xlu0 %712 }
 0x275   : > { %v796_v6 = vsel %vm795_vm5, %v794_v62, %v789_v0  ;;  %v716_v7 = vpop.xlane.xlu1 %715  ;;  %v741_v4 = vadd.f32 %v1341_v29, %v713_v2 }
 0x276   : > { %v803_v11 = vsel %vm802_vm6, %v801_v1, %v796_v6  ;;  %v742_v25 = vadd.f32 %v1341_v29, %v716_v7 }
 0x277   : > { %v810_v20 = vsel %vm809_vm7, %v808_v12, %v803_v11  ;;  %v836_v35 = vrot.slane %v741_v4, %v835_v13 }
 0x278   : > { %v707_v17 = vpop.xlane.xlu0 %706  ;;  %v817_v31 = vsel %vm816_vm8, %v815_v23, %v810_v20  ;;  %v843_v39 = vrot.slane %v742_v25, %v842_v16 }
 0x279   : > { %v739_v21 = vadd.f32 %v1341_v29, %v707_v17  ;;  %v710_v22 = vpop.xlane.xlu1 %709 }
 0x27a   : > { %v740_v26 = vadd.f32 %v1341_v29, %v710_v22 }
 0x27b   : > { %v822_v28 = vrot.slane %v739_v21, %v821_v14 }
 0x27c   : > { %v829_v32 = vrot.slane %v740_v26, %v828_v18  ;;  %v719_v33 = vpop.xlane.xlu0 %718 }
 0x27d   : > { %v824_v36 = vsel %vm823_vm9, %v822_v28, %v817_v31  ;;  %v743_v37 = vadd.f32 %v1341_v29, %v719_v33 }
 0x27e   : > { %v831_v40 = vsel %vm830_vm10, %v829_v32, %v824_v36  ;;  %v722_v41 = vpop.xlane.xlu1 %721 }
 0x27f   : > { %v838_v42 = vsel %vm837_vm11, %v836_v35, %v831_v40  ;;  %v850_v43 = vrot.slane %v743_v37, %v849_v10  ;;  %v744_v44 = vadd.f32 %v1341_v29, %v722_v41 }
 0x280   : > { %v845_v46 = vsel %vm844_vm12, %v843_v39, %v838_v42  ;;  %v725_v47 = vpop.xlane.xlu0 %724 }
 0x281   : > { %v852_v24 = vsel %vm851_vm13, %v850_v43, %v845_v46  ;;  %v857_v48 = vrot.slane %v744_v44, %v856_v34  ;;  %v745_v49 = vadd.f32 %v1341_v29, %v725_v47 }
 0x282   : > { %v728_v51 = vpop.xlane.xlu1 %727 }
 0x283   : > { %v859_v52 = vsel %vm858_vm14, %v857_v48, %v852_v24  ;;  %v864_v53 = vrot.slane %v745_v49, %v863_v45  ;;  %v746_v54 = vadd.f32 %v1341_v29, %v728_v51 }
 0x285   : > { %v871_v55 = vrot.slane %v746_v54, %v870_v50  ;;  %v866_v56 = vsel %vm865_vm15, %v864_v53, %v859_v52 }
 0x287   : > { %v873_v27 = vsel %vm872_vm0, %v871_v55, %v866_v56 }
 0x288   : > { %875 = vst [vmem:[%s272_s19] sm:$0x1] %v873_v27 }
 0x289   : > { %1103 = shalt.err (!%p1100_p3)
}
 0x28a   : > { %s1104_s16 = scalar_lea.hbm %s1402_s23, 16  ;;  %s1108_s15 = scalar_lea.hbm %s1453_s7, 32 }
 0x28b   : > { %p1105_p4 = scmp.ne.s32.totalorder %s1402_s23, %s1104_s16  ;;  %p1109_p9 = scmp.lt.u32.totalorder %s1402_s23, %s1453_s7 }
 0x28c   : > { %p1110_p10 = scmp.lt.u32.totalorder %s1108_s15, %s1104_s16  ;;  %p1112_p12 = scmp.lt.u32.totalorder %s1104_s16, %s1402_s23 }
 0x28d   : > { %p1106_p7 = pnand %p1105_p4, %p1233_p5 }
 0x28e   : > { %p1111_p11 = por %p1110_p10, %p1109_p9 }
 0x28f   : > { %p1107_p8 = pneg %p1106_p7 }
 0x290   : > { %p1113_p13 = por %p1112_p12, %p1111_p11 }
 0x292   : > { %p1114_p0 = pnand %p1113_p13, %p1107_p8 }
 0x294   : > { %1117 = shalt.err (!%p1114_p0)
}
 0x295   : > { %1040 = dma.vmem_to_hbm [thread:$0]  (%p1233_p5), %s1404_s20, 16, %s1402_s23, %s877_s24  }
 0x296 PF: > { %p1046_p1 = scmp.ge.s32.totalorder %s1152_s29, 2  ;;  %s901_s19 = sand.u32 1, %s1140_s26  }
 0x297   : > { %s902_s21 = scalar_lea.sflag [#allocation4], %s901_s19 }
 0x298   : > { %p1043_p2 = pnand %p1046_p1, %p1237_p6 }
 0x29a   : > { %1135 = dma.done.wait (!%p1043_p2), %s902_s21, 16  }
 0x29b   : > { %1137 = vsyncadd (!%p1043_p2), %s902_s21, 4294967280  ;;  %p18_p3 = scmp.ge.s32.totalorder %s1221_s8, 4   ;;  %s1456_s26 = smov %s1144_s27 }
 0x29c   : > { %s1457_s27 = smov %s1148_s28  ;;  %s1458_s28 = smov %s1231_s11 }
 0x29d   : > { %s1459_s29 = smov %s1221_s8  ;;  %20 = sbr.rel (!%p18_p3) target bundleno = 5 (0x5), region = 83 }
 0x2a4   :  { %906 = vsyncpa [#allocation4], 1 }
 0x2a5   :  { %908 = vsyncpa [#allocation4 + $0x1], 1 }

</bundles_post_ra>
